<compile_context>
chip_gen: v7x
topology: tpu7x:2x2x1
jax: 0.10.0
libtpu: 0.0.40
codegen_flags: <defaults>
</compile_context>

<pallas_src>
import math
import jax
import jax.numpy as jnp
import numpy as np
from jax import lax
from jax.experimental import pallas as pl
from jax.experimental.pallas import tpu as pltpu

# ---- small model config consistent with Block/Attention ----
B = 2
S = 8                           # seq_len
DIM = 32                        # args.dim
N_HEADS = 4                     # args.n_heads
N_KV_HEADS = 2                  # args.n_kv_heads
HEAD_DIM = DIM // N_HEADS       # 8
HD2 = HEAD_DIM // 2             # 4
N_REP = N_HEADS // N_KV_HEADS   # 2
EPS = 1e-6                      # args.norm_eps
ROPE_THETA = 10000.0

QDIM = N_HEADS * HEAD_DIM       # 32
KVDIM = N_KV_HEADS * HEAD_DIM   # 16
BHS = B * N_HEADS * S           # 64 blocked-attention rows
LOG2_S = int(math.log2(S))      # S is a power of two


def _block_kernel(x_ref, wqkv_ref, wo_ref, cos_ref, sin_ref, o_ref):
    x = x_ref[...]                         # (B*S, DIM) f32

    # --- RMSNorm (attention_norm); the norm weight is folded into wqkv in wrapper ---
    ms = jnp.mean(x * x, axis=-1, keepdims=True)
    xs = x * lax.rsqrt(ms + EPS)           # (16, 32)

    # --- fused QKV projection: one MXU matmul instead of three ---
    qkv = jnp.dot(xs, wqkv_ref[...], preferred_element_type=jnp.float32)   # (16, 64)
    q = qkv[:, :QDIM]                      # (16, 32)  half-split columns per head
    k = qkv[:, QDIM:QDIM + KVDIM]          # (16, 16)  half-split columns per kv head
    v = qkv[:, QDIM + KVDIM:]              # (16, 16)  original column order

    # --- blocked layout: rows = ((b*H + h)*S + s), cols = head_dim ---
    def blocked(t, is_query):
        parts = []
        for b in range(B):
            for h in range(N_HEADS):
                hh = h if is_query else h // N_REP          # GQA repeat_kv
                parts.append(t[b * S:(b + 1) * S,
                               hh * HEAD_DIM:(hh + 1) * HEAD_DIM])
        return jnp.concatenate(parts, axis=0)               # (B*H*S, HEAD_DIM)

    qq = blocked(q, True)                  # (64, 8)
    kk = blocked(k, False)                 # (64, 8)
    vv = blocked(v, False)                 # (64, 8)

    # --- fused full-width RoPE on stacked Q|K (rotate-half == interleaved RoPE
    #     because the wq/wk columns were half-split-permuted in the wrapper) ---
    qk = jnp.concatenate([qq, kk], axis=0)                  # (128, 8)
    cos = cos_ref[...]                     # (128, HD2) pre-tiled per (q|k, b, h, s)
    sin = sin_ref[...]
    a1, a2 = qk[:, :HD2], qk[:, HD2:]
    qk_rot = jnp.concatenate([a1 * cos - a2 * sin,
                              a1 * sin + a2 * cos], axis=1)  # (128, 8)
    qr = qk_rot[:BHS]                      # (64, 8)
    kr = qk_rot[BHS:]                      # (64, 8)

    # --- one blocked scores matmul over all (batch, head) pairs ---
    dims = (((1,), (1,)), ((), ()))        # qr @ kr^T
    scores = lax.dot_general(qr, kr, dims, preferred_element_type=jnp.float32)
    scores = scores * (1.0 / math.sqrt(HEAD_DIM))           # (64, 64)

    # block-diagonal (batch, head) mask built from iota -> no extra operand DMA
    row_blk = lax.broadcasted_iota(jnp.int32, (BHS, BHS), 0) >> LOG2_S
    col_blk = lax.broadcasted_iota(jnp.int32, (BHS, BHS), 1) >> LOG2_S
    keep = row_blk == col_blk

    # softmax over keys (masking after exp with the global row max is identical
    # to masked softmax); normalization via EUP approx reciprocal
    m = jnp.max(scores, axis=-1, keepdims=True)
    p = jnp.where(keep, jnp.exp(scores - m), 0.0)
    denom = jnp.sum(p, axis=-1, keepdims=True)
    probs = p * pl.reciprocal(denom, approx=True)

    out_blk = jnp.dot(probs, vv, preferred_element_type=jnp.float32)   # (64, 8)

    # --- back to (B*S, H*HEAD_DIM), single output projection, residual ---
    rows = []
    for b in range(B):
        heads = [out_blk[(b * N_HEADS + h) * S:(b * N_HEADS + h + 1) * S, :]
                 for h in range(N_HEADS)]
        rows.append(jnp.concatenate(heads, axis=1))          # (S, H*HEAD_DIM)
    out_flat = jnp.concatenate(rows, axis=0)                 # (16, 32)

    o_ref[...] = x + jnp.dot(out_flat, wo_ref[...],
                             preferred_element_type=jnp.float32)


@jax.jit
def block_forward(x, wqkv_scaled, wo_t, cos_b, sin_b):
    x2 = x.reshape(B * S, DIM)             # free XLA reshape outside the kernel
    vmem = pl.BlockSpec(memory_space=pltpu.MemorySpace.VMEM)   # whole array in VMEM
    out = pl.pallas_call(
        _block_kernel,
        out_shape=jax.ShapeDtypeStruct((B * S, DIM), jnp.float32),
        in_specs=[vmem] * 5,
        out_specs=vmem,
    )(x2, wqkv_scaled, wo_t, cos_b, sin_b)
    return out.reshape(B, S, DIM)


# ---------------- pure-JAX reference (mirrors the PyTorch forward) ----------------
def reference_block(x, wq, wk, wv, wo, norm_w, cos, sin):
    # wq/wk/wv/wo are torch nn.Linear weights: (out_features, in_features)
    ms = jnp.mean(x.astype(jnp.float32) ** 2, axis=-1, keepdims=True)
    xn = norm_w * (x * lax.rsqrt(ms + EPS))
    xq = (xn @ wq.T).reshape(B, S, N_HEADS, HEAD_DIM)
    xk = (xn @ wk.T).reshape(B, S, N_KV_HEADS, HEAD_DIM)
    xv = (xn @ wv.T).reshape(B, S, N_KV_HEADS, HEAD_DIM)

    def rope(t):                                  # interleaved (complex) RoPE
        tr = t.reshape(*t.shape[:-1], HD2, 2)
        tre, tim = tr[..., 0], tr[..., 1]
        c = cos[None, :, None, :]
        s = sin[None, :, None, :]
        ore = tre * c - tim * s
        oim = tre * s + tim * c
        return jnp.stack([ore, oim], axis=-1).reshape(t.shape)

    xq = rope(xq)
    xk = rope(xk)
    xk = jnp.repeat(xk, N_REP, axis=2)            # repeat_kv
    xv = jnp.repeat(xv, N_REP, axis=2)
    xq = xq.transpose(0, 2, 1, 3)
    xk = xk.transpose(0, 2, 1, 3)
    xv = xv.transpose(0, 2, 1, 3)
    scores = jnp.einsum("bhqd,bhkd->bhqk", xq, xk) / math.sqrt(HEAD_DIM)
    # masked_fill in the reference is non-in-place and discarded -> no mask
    probs = jax.nn.softmax(scores.astype(jnp.float32), axis=-1)
    out = jnp.einsum("bhqk,bhkd->bhqd", probs, xv)
    out = out.transpose(0, 2, 1, 3).reshape(B, S, N_HEADS * HEAD_DIM)
    return x + out @ wo.T


if __name__ == "__main__":
    key = jax.random.PRNGKey(0)
    k1, k2, k3, k4, k5 = jax.random.split(key, 5)
    scale = 0.1
    x = jax.random.normal(k1, (B, S, DIM), jnp.float32)
    # torch nn.Linear weight shapes: (out, in)
    wq = jax.random.normal(k2, (N_HEADS * HEAD_DIM, DIM), jnp.float32) * scale
    wk = jax.random.normal(k3, (N_KV_HEADS * HEAD_DIM, DIM), jnp.float32) * scale
    wv = jax.random.normal(k4, (N_KV_HEADS * HEAD_DIM, DIM), jnp.float32) * scale
    wo = jax.random.normal(k5, (DIM, N_HEADS * HEAD_DIM), jnp.float32) * scale
    norm_w = jnp.ones((DIM,), jnp.float32)        # RMSNorm init = ones

    # RoPE tables (freqs_complex equivalent: cos/sin of position * inv_freq)
    inv_freq = 1.0 / (ROPE_THETA ** (np.arange(0, HEAD_DIM, 2) / HEAD_DIM))
    angles = np.outer(np.arange(S), inv_freq)     # (S, HD2)
    cos = jnp.asarray(np.cos(angles), jnp.float32)
    sin = jnp.asarray(np.sin(angles), jnp.float32)

    # Kernel weight prep: transpose to (in, out); permute wq/wk output columns
    # within each head from interleaved-pair order to half-split order; fuse QKV;
    # fold the RMSNorm weight into the fused QKV weight rows.
    def half_split_perm(n_heads):
        idx = []
        for h in range(n_heads):
            base = h * HEAD_DIM
            idx += [base + 2 * j for j in range(HD2)]
            idx += [base + 2 * j + 1 for j in range(HD2)]
        return np.array(idx)

    wq_t = jnp.asarray(np.asarray(wq.T)[:, half_split_perm(N_HEADS)])
    wk_t = jnp.asarray(np.asarray(wk.T)[:, half_split_perm(N_KV_HEADS)])
    wqkv = jnp.concatenate([wq_t, wk_t, wv.T], axis=1)      # (DIM, QDIM+2*KVDIM) = (32, 64)
    wqkv_scaled = norm_w[:, None] * wqkv                    # fold RMSNorm weight
    wo_t = wo.T                                             # (H*Dh, DIM)

    # cos/sin tiled to the stacked (q|k) x (batch*head, seq) blocked row order
    cos_b = jnp.tile(cos, (2 * B * N_HEADS, 1))             # (128, HD2)
    sin_b = jnp.tile(sin, (2 * B * N_HEADS, 1))

    out = block_forward(x, wqkv_scaled, wo_t, cos_b, sin_b)
    out = jax.block_until_ready(out)

    ref = reference_block(x, wq, wk, wv, wo, norm_w, cos, sin)
    err = float(jnp.max(jnp.abs(out - ref)))
    # 1e-3 tolerance: pl.reciprocal(approx=True) contributes ~1e-4 relative error
    # to the softmax normalization; everything else is exact f32.
    assert err < 1e-3, f"kernel/reference mismatch, max abs err = {err}"
    print("KERNEL_OK")
</pallas_src>

<mosaic_0001>
module attributes {stable_mosaic.version = 11 : i64} {
  func.func @_block_kernel(%arg0: memref<16x32xf32, #tpu.memory_space<vmem>>, %arg1: memref<32x64xf32, #tpu.memory_space<vmem>>, %arg2: memref<32x32xf32, #tpu.memory_space<vmem>>, %arg3: memref<128x4xf32, #tpu.memory_space<vmem>>, %arg4: memref<128x4xf32, #tpu.memory_space<vmem>>, %arg5: memref<16x32xf32, #tpu.memory_space<vmem>>) attributes {dimension_semantics = [], scalar_prefetch = 0 : i64, scratch_operands = 0 : i64, tpu.core_type = #tpu.core_type<tc>} {
    %c0 = arith.constant 0 : index
    %c0_0 = arith.constant 0 : index
    %0 = vector.load %arg0[%c0, %c0_0] : memref<16x32xf32, #tpu.memory_space<vmem>>, vector<16x32xf32>
    %1 = arith.mulf %0, %0 : vector<16x32xf32>
    %cst = arith.constant dense<0.000000e+00> : vector<16xf32>
    %2 = vector.multi_reduction <add>, %1, %cst [1] : vector<16x32xf32> to vector<16xf32>
    %3 = vector.shape_cast %2 : vector<16xf32> to vector<16x1xf32>
    %cst_1 = arith.constant 3.200000e+01 : f32
    %4 = vector.broadcast %cst_1 : f32 to vector<16x1xf32>
    %5 = arith.divf %3, %4 : vector<16x1xf32>
    %cst_2 = arith.constant 9.99999997E-7 : f32
    %6 = vector.broadcast %cst_2 : f32 to vector<16x1xf32>
    %7 = arith.addf %5, %6 : vector<16x1xf32>
    %8 = math.rsqrt %7 : vector<16x1xf32>
    %9 = vector.broadcast %8 : vector<16x1xf32> to vector<16x32xf32>
    %10 = arith.mulf %0, %9 : vector<16x32xf32>
    %c0_3 = arith.constant 0 : index
    %c0_4 = arith.constant 0 : index
    %11 = vector.load %arg1[%c0_3, %c0_4] : memref<32x64xf32, #tpu.memory_space<vmem>>, vector<32x64xf32>
    %cst_5 = arith.constant dense<0.000000e+00> : vector<16x64xf32>
    %12 = tpu.matmul %10, %11, %cst_5 {dimension_numbers = #tpu.dot_dimension_numbers<[1], [0], [0], [1], [0, 0, 1, 1], [], []>} : vector<16x32xf32>, vector<32x64xf32>, vector<16x64xf32> -> vector<16x64xf32>
    %13 = vector.extract_strided_slice %12 {offsets = [0, 0], sizes = [16, 32], strides = [1, 1]} : vector<16x64xf32> to vector<16x32xf32>
    %14 = vector.extract_strided_slice %12 {offsets = [0, 32], sizes = [16, 16], strides = [1, 1]} : vector<16x64xf32> to vector<16x16xf32>
    %15 = vector.extract_strided_slice %12 {offsets = [0, 48], sizes = [16, 16], strides = [1, 1]} : vector<16x64xf32> to vector<16x16xf32>
    %16 = vector.extract_strided_slice %13 {offsets = [0, 0], sizes = [8, 8], strides = [1, 1]} : vector<16x32xf32> to vector<8x8xf32>
    %17 = vector.extract_strided_slice %13 {offsets = [0, 8], sizes = [8, 8], strides = [1, 1]} : vector<16x32xf32> to vector<8x8xf32>
    %18 = vector.extract_strided_slice %13 {offsets = [0, 16], sizes = [8, 8], strides = [1, 1]} : vector<16x32xf32> to vector<8x8xf32>
    %19 = vector.extract_strided_slice %13 {offsets = [0, 24], sizes = [8, 8], strides = [1, 1]} : vector<16x32xf32> to vector<8x8xf32>
    %20 = vector.extract_strided_slice %13 {offsets = [8, 0], sizes = [8, 8], strides = [1, 1]} : vector<16x32xf32> to vector<8x8xf32>
    %21 = vector.extract_strided_slice %13 {offsets = [8, 8], sizes = [8, 8], strides = [1, 1]} : vector<16x32xf32> to vector<8x8xf32>
    %22 = vector.extract_strided_slice %13 {offsets = [8, 16], sizes = [8, 8], strides = [1, 1]} : vector<16x32xf32> to vector<8x8xf32>
    %23 = vector.extract_strided_slice %13 {offsets = [8, 24], sizes = [8, 8], strides = [1, 1]} : vector<16x32xf32> to vector<8x8xf32>
    %24 = tpu.concatenate %16, %17, %18, %19, %20, %21, %22, %23 in 0 : vector<8x8xf32>, vector<8x8xf32>, vector<8x8xf32>, vector<8x8xf32>, vector<8x8xf32>, vector<8x8xf32>, vector<8x8xf32>, vector<8x8xf32> -> vector<64x8xf32>
    %25 = vector.extract_strided_slice %14 {offsets = [0, 0], sizes = [8, 8], strides = [1, 1]} : vector<16x16xf32> to vector<8x8xf32>
    %26 = vector.extract_strided_slice %14 {offsets = [0, 0], sizes = [8, 8], strides = [1, 1]} : vector<16x16xf32> to vector<8x8xf32>
    %27 = vector.extract_strided_slice %14 {offsets = [0, 8], sizes = [8, 8], strides = [1, 1]} : vector<16x16xf32> to vector<8x8xf32>
    %28 = vector.extract_strided_slice %14 {offsets = [0, 8], sizes = [8, 8], strides = [1, 1]} : vector<16x16xf32> to vector<8x8xf32>
    %29 = vector.extract_strided_slice %14 {offsets = [8, 0], sizes = [8, 8], strides = [1, 1]} : vector<16x16xf32> to vector<8x8xf32>
    %30 = vector.extract_strided_slice %14 {offsets = [8, 0], sizes = [8, 8], strides = [1, 1]} : vector<16x16xf32> to vector<8x8xf32>
    %31 = vector.extract_strided_slice %14 {offsets = [8, 8], sizes = [8, 8], strides = [1, 1]} : vector<16x16xf32> to vector<8x8xf32>
    %32 = vector.extract_strided_slice %14 {offsets = [8, 8], sizes = [8, 8], strides = [1, 1]} : vector<16x16xf32> to vector<8x8xf32>
    %33 = tpu.concatenate %25, %26, %27, %28, %29, %30, %31, %32 in 0 : vector<8x8xf32>, vector<8x8xf32>, vector<8x8xf32>, vector<8x8xf32>, vector<8x8xf32>, vector<8x8xf32>, vector<8x8xf32>, vector<8x8xf32> -> vector<64x8xf32>
    %34 = vector.extract_strided_slice %15 {offsets = [0, 0], sizes = [8, 8], strides = [1, 1]} : vector<16x16xf32> to vector<8x8xf32>
    %35 = vector.extract_strided_slice %15 {offsets = [0, 0], sizes = [8, 8], strides = [1, 1]} : vector<16x16xf32> to vector<8x8xf32>
    %36 = vector.extract_strided_slice %15 {offsets = [0, 8], sizes = [8, 8], strides = [1, 1]} : vector<16x16xf32> to vector<8x8xf32>
    %37 = vector.extract_strided_slice %15 {offsets = [0, 8], sizes = [8, 8], strides = [1, 1]} : vector<16x16xf32> to vector<8x8xf32>
    %38 = vector.extract_strided_slice %15 {offsets = [8, 0], sizes = [8, 8], strides = [1, 1]} : vector<16x16xf32> to vector<8x8xf32>
    %39 = vector.extract_strided_slice %15 {offsets = [8, 0], sizes = [8, 8], strides = [1, 1]} : vector<16x16xf32> to vector<8x8xf32>
    %40 = vector.extract_strided_slice %15 {offsets = [8, 8], sizes = [8, 8], strides = [1, 1]} : vector<16x16xf32> to vector<8x8xf32>
    %41 = vector.extract_strided_slice %15 {offsets = [8, 8], sizes = [8, 8], strides = [1, 1]} : vector<16x16xf32> to vector<8x8xf32>
    %42 = tpu.concatenate %34, %35, %36, %37, %38, %39, %40, %41 in 0 : vector<8x8xf32>, vector<8x8xf32>, vector<8x8xf32>, vector<8x8xf32>, vector<8x8xf32>, vector<8x8xf32>, vector<8x8xf32>, vector<8x8xf32> -> vector<64x8xf32>
    %43 = tpu.concatenate %24, %33 in 0 : vector<64x8xf32>, vector<64x8xf32> -> vector<128x8xf32>
    %c0_6 = arith.constant 0 : index
    %c0_7 = arith.constant 0 : index
    %44 = vector.load %arg3[%c0_6, %c0_7] : memref<128x4xf32, #tpu.memory_space<vmem>>, vector<128x4xf32>
    %c0_8 = arith.constant 0 : index
    %c0_9 = arith.constant 0 : index
    %45 = vector.load %arg4[%c0_8, %c0_9] : memref<128x4xf32, #tpu.memory_space<vmem>>, vector<128x4xf32>
    %46 = vector.extract_strided_slice %43 {offsets = [0, 0], sizes = [128, 4], strides = [1, 1]} : vector<128x8xf32> to vector<128x4xf32>
    %47 = vector.extract_strided_slice %43 {offsets = [0, 4], sizes = [128, 4], strides = [1, 1]} : vector<128x8xf32> to vector<128x4xf32>
    %48 = arith.mulf %46, %44 : vector<128x4xf32>
    %49 = arith.mulf %47, %45 : vector<128x4xf32>
    %50 = arith.subf %48, %49 : vector<128x4xf32>
    %51 = arith.mulf %46, %45 : vector<128x4xf32>
    %52 = arith.mulf %47, %44 : vector<128x4xf32>
    %53 = arith.addf %51, %52 : vector<128x4xf32>
    %54 = tpu.concatenate %50, %53 in 1 : vector<128x4xf32>, vector<128x4xf32> -> vector<128x8xf32>
    %55 = vector.extract_strided_slice %54 {offsets = [0, 0], sizes = [64, 8], strides = [1, 1]} : vector<128x8xf32> to vector<64x8xf32>
    %56 = vector.extract_strided_slice %54 {offsets = [64, 0], sizes = [64, 8], strides = [1, 1]} : vector<128x8xf32> to vector<64x8xf32>
    %cst_10 = arith.constant dense<0.000000e+00> : vector<64x64xf32>
    %57 = tpu.matmul %55, %56, %cst_10 {dimension_numbers = #tpu.dot_dimension_numbers<[1], [1], [0], [0], [0, 0, 1, 0], [], []>} : vector<64x8xf32>, vector<64x8xf32>, vector<64x64xf32> -> vector<64x64xf32>
    %cst_11 = arith.constant 0.353553385 : f32
    %58 = vector.broadcast %cst_11 : f32 to vector<64x64xf32>
    %59 = arith.mulf %57, %58 : vector<64x64xf32>
    %60 = tpu.iota {dimensions = array<i32: 0>} : vector<64x64xi32>
    %c3_i32 = arith.constant 3 : i32
    %61 = vector.broadcast %c3_i32 : i32 to vector<64x64xi32>
    %62 = arith.shrsi %60, %61 : vector<64x64xi32>
    %63 = tpu.iota {dimensions = array<i32: 1>} : vector<64x64xi32>
    %c3_i32_12 = arith.constant 3 : i32
    %64 = vector.broadcast %c3_i32_12 : i32 to vector<64x64xi32>
    %65 = arith.shrsi %63, %64 : vector<64x64xi32>
    %66 = arith.cmpi eq, %62, %65 : vector<64x64xi32>
    %cst_13 = arith.constant dense<0xFF800000> : vector<64xf32>
    %67 = vector.multi_reduction <maximumf>, %59, %cst_13 [1] : vector<64x64xf32> to vector<64xf32>
    %68 = vector.shape_cast %67 : vector<64xf32> to vector<64x1xf32>
    %69 = vector.broadcast %68 : vector<64x1xf32> to vector<64x64xf32>
    %70 = arith.subf %59, %69 : vector<64x64xf32>
    %71 = math.exp %70 : vector<64x64xf32>
    %cst_14 = arith.constant 0.000000e+00 : f32
    %72 = vector.broadcast %cst_14 : f32 to vector<64x64xf32>
    %73 = arith.select %66, %71, %72 : vector<64x64xi1>, vector<64x64xf32>
    %cst_15 = arith.constant dense<0.000000e+00> : vector<64xf32>
    %74 = vector.multi_reduction <add>, %73, %cst_15 [1] : vector<64x64xf32> to vector<64xf32>
    %75 = vector.shape_cast %74 : vector<64xf32> to vector<64x1xf32>
    %76 = tpu.reciprocal %75 {approx = true} : vector<64x1xf32> -> vector<64x1xf32>
    %77 = vector.broadcast %76 : vector<64x1xf32> to vector<64x64xf32>
    %78 = arith.mulf %73, %77 : vector<64x64xf32>
    %cst_16 = arith.constant dense<0.000000e+00> : vector<64x8xf32>
    %79 = tpu.matmul %78, %42, %cst_16 {dimension_numbers = #tpu.dot_dimension_numbers<[1], [0], [0], [1], [0, 0, 1, 1], [], []>} : vector<64x64xf32>, vector<64x8xf32>, vector<64x8xf32> -> vector<64x8xf32>
    %80 = vector.extract_strided_slice %79 {offsets = [0, 0], sizes = [8, 8], strides = [1, 1]} : vector<64x8xf32> to vector<8x8xf32>
    %81 = vector.extract_strided_slice %79 {offsets = [8, 0], sizes = [8, 8], strides = [1, 1]} : vector<64x8xf32> to vector<8x8xf32>
    %82 = vector.extract_strided_slice %79 {offsets = [16, 0], sizes = [8, 8], strides = [1, 1]} : vector<64x8xf32> to vector<8x8xf32>
    %83 = vector.extract_strided_slice %79 {offsets = [24, 0], sizes = [8, 8], strides = [1, 1]} : vector<64x8xf32> to vector<8x8xf32>
    %84 = tpu.concatenate %80, %81, %82, %83 in 1 : vector<8x8xf32>, vector<8x8xf32>, vector<8x8xf32>, vector<8x8xf32> -> vector<8x32xf32>
    %85 = vector.extract_strided_slice %79 {offsets = [32, 0], sizes = [8, 8], strides = [1, 1]} : vector<64x8xf32> to vector<8x8xf32>
    %86 = vector.extract_strided_slice %79 {offsets = [40, 0], sizes = [8, 8], strides = [1, 1]} : vector<64x8xf32> to vector<8x8xf32>
    %87 = vector.extract_strided_slice %79 {offsets = [48, 0], sizes = [8, 8], strides = [1, 1]} : vector<64x8xf32> to vector<8x8xf32>
    %88 = vector.extract_strided_slice %79 {offsets = [56, 0], sizes = [8, 8], strides = [1, 1]} : vector<64x8xf32> to vector<8x8xf32>
    %89 = tpu.concatenate %85, %86, %87, %88 in 1 : vector<8x8xf32>, vector<8x8xf32>, vector<8x8xf32>, vector<8x8xf32> -> vector<8x32xf32>
    %90 = tpu.concatenate %84, %89 in 0 : vector<8x32xf32>, vector<8x32xf32> -> vector<16x32xf32>
    %c0_17 = arith.constant 0 : index
    %c0_18 = arith.constant 0 : index
    %91 = vector.load %arg2[%c0_17, %c0_18] : memref<32x32xf32, #tpu.memory_space<vmem>>, vector<32x32xf32>
    %cst_19 = arith.constant dense<0.000000e+00> : vector<16x32xf32>
    %92 = tpu.matmul %90, %91, %cst_19 {dimension_numbers = #tpu.dot_dimension_numbers<[1], [0], [0], [1], [0, 0, 1, 1], [], []>} : vector<16x32xf32>, vector<32x32xf32>, vector<16x32xf32> -> vector<16x32xf32>
    %93 = arith.addf %0, %92 : vector<16x32xf32>
    %c0_20 = arith.constant 0 : index
    %c0_21 = arith.constant 0 : index
    %94 = vector.load %arg5[%c0_20, %c0_21] : memref<16x32xf32, #tpu.memory_space<vmem>>, vector<16x32xf32>
    tpu.vector_store %arg5[%c0_20, %c0_21], %93 {strides = array<i32>} : memref<16x32xf32, #tpu.memory_space<vmem>>, vector<16x32xf32>,
    return
  }
}

</mosaic_0001>

<bundles_post_ra>
// kernel: block_forward.1
= control target key start
LH: loop header
LB: loop body
LE: loop exit
PB: predicated region body
PF: predicated region fallthrough
CT: control target
= control target key end

     0   :  { %vm25_vm0 = vcmask 261120   ;;  %s2095_s0 = inlined_call_operand.vmem [shape: f32[16,32], index: 0, kind: input, shape index: {}]   ;;  %s2096_s1 = inlined_call_operand.vmem [shape: f32[32,64], index: 1, kind: input, shape index: {}]   ;;  %s2097_s2 = inlined_call_operand.vmem [shape: f32[32,32], index: 2, kind: input, shape index: {}]   ;;  %s2098_s3 = inlined_call_operand.vmem [shape: f32[128,4], index: 3, kind: input, shape index: {}]   ;;  %s2099_s4 = inlined_call_operand.vmem [shape: f32[128,4], index: 4, kind: input, shape index: {}]   ;;  %s2100_s5 = inlined_call_operand.hbm [shape: f32[16,32], index: 5, kind: output, shape index: {}]  }
   0x1   :  { %v21_v0 = vld [vmem:[%s2095_s0] sm:$0xff]  ;;  %v22_v1 = vld [vmem:[%s2095_s0 + $0x8] sm:$0xff] }
   0x2   :  { %10 = vsyncpa [#allocation3], 0  ;;  %v23_v2 = vmul.f32 %v21_v0, %v21_v0  ;;  %v24_v3 = vmul.f32 %v22_v1, %v22_v1  ;;  %v41_v6 = vld [vmem:[%s2096_s1] sm:$0xff]  ;;  %v42_v7 = vld [vmem:[%s2096_s1 + $0x8] sm:$0xff]  ;;  %s1494_s30 = smov 120   ;;  %s1495_s8 = smov 4  }
   0x3   :  { %v43_v8 = vld [vmem:[%s2096_s1 + $0x10] sm:$0xff]  ;;  %v1338_v9 = vpack.c.bf16 %v42_v7, %v41_v6  ;;  %v44_v10 = vld [vmem:[%s2096_s1 + $0x18] sm:$0xff]  ;;  %s1493_s1 = smov 96   ;;  %v1566_v24 = vld [vmem:[%s2098_s3 + $0x60] sm:$0xff]  ;;  %s1497_s9 = smov 104   ;;  %vm606_vm1 = vcmask 31744  }
   0x4   :  { %v26_v4 = vsel %vm25_vm0, %v23_v2, 0.0  ;;  %v29_v5 = vsel %vm25_vm0, %v24_v3, 0.0  ;;  %v1342_v11 = vpack.c.bf16 %v44_v10, %v43_v8  ;;  %v1574_v25 = vld [vmem:[%s2098_s3 + $0x40] sm:$0xff]  ;;  %v1581_v26 = vld [vmem:[%s2098_s3 + $0x48] sm:$0xff]  ;;  %v1588_v27 = vld [vmem:[%s2098_s3 + $0x50] sm:$0xff]  ;;  %s1498_s27 = smov 124  }
   0x5   :  { %27 = vadd.xlane.f32.xlu0 %v26_v4  ;;  %1339 = vmatprep.subr.bf16.mxu0 %v1338_v9  ;;  %v1595_v28 = vld [vmem:[%s2098_s3 + $0x58] sm:$0xff]  ;;  %v1609_v31 = vld [vmem:[%s2098_s3 + $0x68] sm:$0xff]  ;;  %v1623_v33 = vld [vmem:[%s2098_s3 + $0x70] sm:$0xff]  ;;  %vm623_vm2 = vcmask 64512   ;;  %vm813_vm4 = vcmask 523264   ;;  %s1500_s29 = smov 8  }
   0x6   :  { %1341 = vmatpush3.bf16.msra.mxu0 %v1338_v9  ;;  %v1614_v32 = vld [vmem:[%s2098_s3 + $0x78] sm:$0xff]  ;;  %v1628_v34 = vld [vmem:[%s2098_s3 + $0x8] sm:$0xff]  ;;  %v1637_v35 = vld [vmem:[%s2098_s3 + $0x10] sm:$0xff]  ;;  %vm1064_vm13 = vcmask 130048   ;;  %vm1066_vm14 = vcmask 195584  }
   0x7   :  { %1343 = vmatprep.subr.bf16.mxu0 %v1342_v11  ;;  %v1642_v36 = vld [vmem:[%s2098_s3] sm:$0xff]  ;;  %v1651_v37 = vld [vmem:[%s2098_s3 + $0x18] sm:$0xff]  ;;  %v1659_v38 = vld [vmem:[%s2098_s3 + $0x28] sm:$0xff] }
   0x8   :  { %v1667_v39 = vld [vmem:[%s2098_s3 + $0x30] sm:$0xff]  ;;  %v1672_v40 = vld [vmem:[%s2098_s3 + $0x20] sm:$0xff]  ;;  %v1681_v41 = vld [vmem:[%s2098_s3 + $0x38] sm:$0xff] }
   0x9   :  { %30 = vadd.xlane.f32.xlu0 %v29_v5  ;;  %v1689_v42 = vld [vmem:[%s2099_s4 + $0x48] sm:$0xff]  ;;  %v1697_v44 = vld [vmem:[%s2099_s4 + $0x58] sm:$0xff]  ;;  %v1702_v45 = vld [vmem:[%s2099_s4 + $0x40] sm:$0xff] }
   0xa   :  { %1345 = vmatpush3.bf16.msra.mxu0 %v1342_v11  ;;  %v1711_v46 = vld [vmem:[%s2099_s4 + $0x50] sm:$0xff]  ;;  %v1716_v47 = vld [vmem:[%s2099_s4 + $0x68] sm:$0xff]  ;;  %v1727_v50 = vld [vmem:[%s2099_s4 + $0x60] sm:$0xff] }
   0xb   :  { %v1751_v3 = vld [vmem:[%s2099_s4 + $0x70] sm:$0xff]  ;;  %v1760_v7 = vld [vmem:[%s2099_s4 + $0x78] sm:$0xff]  ;;  %v1771_v11 = vld [vmem:[%s2099_s4] sm:$0xff] }
   0xc   :  { %vm1931_vm3 = vmpackc.low %vm623_vm2, %vm623_vm2 }
  0x92   :  { %v28_v12 = vpop.xlane.xlu0 %27 }
  0x93   :  { %v33_v13 = vmul.f32 0.03125, %v28_v12 }
  0x95   :  { %v35_v14 = vadd.f32 1e-06, %v33_v13 }
  0x96   :  { %v31_v15 = vpop.xlane.xlu0 %30 }
  0x97   :  { %1431 = vrsqrt.f32 %v35_v14  ;;  %v34_v16 = vmul.f32 0.03125, %v31_v15  ;;  %v1782_v15 = vld [vmem:[%s2099_s4 + $0x8] sm:$0xff] }
  0x99   :  { %v36_v17 = vadd.f32 1e-06, %v34_v16 }
  0x9b   :  { %1433 = vrsqrt.f32 %v36_v17 }
  0xa1   :  { %v1432_v18 = vpop.eup %1431 }
  0xa2   :  { %v39_v19 = vmul.f32 %v1432_v18, %v21_v0 }
  0xa4   :  { %1268 = vmatprep.mubr.msk.f32.mxu0 %vm25_vm0, %v39_v19  ;;  %v1791_v19 = vld [vmem:[%s2099_s4 + $0x10] sm:$0xff] }
  0xa5   :  { %v1434_v20 = vpop.eup %1433 }
  0xa6   :  { %v40_v21 = vmul.f32 %v1434_v20, %v22_v1 }
  0xa8   :  { %1269 = vmatmul.mubr.msk.f32.vlgmr.msra.gmra.mrb[0].mxu0 %vm25_vm0, %v40_v21 }
 0x17b   :  { %v1557_v22 = vpop.f32.mrb[0].mxu0 }
 0x17c   :  { %v1559_v23 = vpop.f32.mrb[1].mxu0 }
 0x17d   :  { %146 = vrot.lane.b32.xlu0 %v1559_v23, %s1493_s1  ;;  %127 = vrot.lane.b32.xlu1 %v1559_v23, %s1494_s30 }
 0x181   :  { %137 = vrot.lane.b32.xlu1 %v1557_v22, %s1494_s30  ;;  %422 = vrot.lane.b32.xlu0 %v1566_v24, %s1495_s8  ;;  %s1496_s30 = smov 112  }
 0x185   :  { %414 = vrot.lane.b32.xlu1 %v1574_v25, %s1495_s8 }
 0x189   :  { %416 = vrot.lane.b32.xlu1 %v1581_v26, %s1495_s8 }
 0x18d   :  { %418 = vrot.lane.b32.xlu1 %v1588_v27, %s1495_s8 }
 0x191   :  { %420 = vrot.lane.b32.xlu1 %v1595_v28, %s1495_s8 }
 0x1ef   :  { %v1599_v29 = vpop.permute.xlu1 %127  ;;  %v1722_v49 = vpop.permute.xlu0 %146 }
 0x1f0   :  { %148 = vrot.lane.b32.xlu1 %v1599_v29, %s1493_s1 }
 0x1f3   :  { %v1602_v30 = vpop.permute.xlu1 %137  ;;  %v423_v55 = vpop.permute.xlu0 %422 }
 0x1f4   :  { %150 = vrot.lane.b32.xlu1 %v1557_v22, %s1493_s1  ;;  %152 = vrot.lane.b32.xlu0 %v1602_v30, %s1493_s1  ;;  %s1501_s1 = smov 24  }
 0x1f7   :  { %v415_v43 = vpop.permute.xlu1 %414 }
 0x1f8   :  { %424 = vrot.lane.b32.xlu1 %v1609_v31, %s1495_s8  ;;  %428 = vrot.lane.b32.xlu0 %v1614_v32, %s1495_s8  ;;  %v454_v52 = vmul.f32 %v415_v43, %v1722_v49 }
 0x1fb   :  { %v417_v48 = vpop.permute.xlu1 %416 }
 0x1fc   :  { %426 = vrot.lane.b32.xlu1 %v1623_v33, %s1495_s8  ;;  %400 = vrot.lane.b32.xlu0 %v1628_v34, %s1495_s8  ;;  %v455_v51 = vmul.f32 %v417_v48, %v1722_v49  ;;  %v1802_v48 = vld [vmem:[%s2099_s4 + $0x18] sm:$0xff] }
 0x1ff   :  { %v419_v53 = vpop.permute.xlu1 %418 }
 0x200   :  { %398 = vrot.lane.b32.xlu1 %v1642_v36, %s1495_s8  ;;  %402 = vrot.lane.b32.xlu0 %v1637_v35, %s1495_s8 }
 0x203   :  { %v421_v54 = vpop.permute.xlu1 %420 }
 0x204   :  { %130 = vrot.lane.b32.xlu1 %v1559_v23, %s1496_s30  ;;  %404 = vrot.lane.b32.xlu0 %v1651_v37, %s1495_s8 }
 0x208   :  { %133 = vrot.lane.b32.xlu1 %v1559_v23, %s1497_s9  ;;  %408 = vrot.lane.b32.xlu0 %v1659_v38, %s1495_s8 }
 0x20c   :  { %406 = vrot.lane.b32.xlu1 %v1672_v40, %s1495_s8  ;;  %410 = vrot.lane.b32.xlu0 %v1667_v39, %s1495_s8 }
 0x210   :  { %140 = vrot.lane.b32.xlu1 %v1557_v22, %s1496_s30  ;;  %412 = vrot.lane.b32.xlu0 %v1681_v41, %s1495_s8  ;;  %s1502_s30 = smov 16  }
 0x214   :  { %143 = vrot.lane.b32.xlu1 %v1557_v22, %s1497_s9  ;;  %240 = vrot.lane.b32.xlu0 %v1689_v42, %s1495_s8 }
 0x218   :  { %238 = vrot.lane.b32.xlu1 %v1702_v45, %s1495_s8  ;;  %244 = vrot.lane.b32.xlu0 %v1697_v44, %s1495_s8 }
 0x21c   :  { %242 = vrot.lane.b32.xlu1 %v1711_v46, %s1495_s8  ;;  %248 = vrot.lane.b32.xlu0 %v1716_v47, %s1495_s8 }
 0x220   :  { %246 = vrot.lane.b32.xlu1 %v1727_v50, %s1495_s8  ;;  %496 = vrot.lane.b32.xlu0 %v455_v51, %s1498_s27 }
 0x224   :  { %494 = vrot.lane.b32.xlu1 %v454_v52, %s1498_s27 }
 0x262   :  { %v1735_v56 = vpop.permute.xlu1 %148 }
 0x263   :  { %v456_v63 = vmul.f32 %v419_v53, %v1735_v56  ;;  %v457_v2 = vmul.f32 %v421_v54, %v1735_v56  ;;  %v1813_v54 = vld [vmem:[%s2099_s4 + $0x20] sm:$0xff] }
 0x266   :  { %v1737_v57 = vpop.permute.xlu0 %152  ;;  %v1739_v58 = vpop.permute.xlu1 %150 }
 0x267   :  { %v458_v59 = vmul.f32 %v423_v55, %v1739_v58 }
 0x269   :  { %502 = vrot.lane.b32.xlu1 %v458_v59, %s1498_s27 }
 0x26a   :  { %v429_v60 = vpop.permute.xlu0 %428  ;;  %v425_v61 = vpop.permute.xlu1 %424 }
 0x26b   :  { %v459_v62 = vmul.f32 %v425_v61, %v1739_v58  ;;  %v461_v10 = vmul.f32 %v429_v60, %v1737_v57  ;;  %v1822_v61 = vld [vmem:[%s2099_s4 + $0x28] sm:$0xff] }
 0x26d   :  { %498 = vrot.lane.b32.xlu1 %v456_v63, %s1498_s27  ;;  %504 = vrot.lane.b32.xlu0 %v459_v62, %s1498_s27 }
 0x26e   :  { %v401_v0 = vpop.permute.xlu0 %400  ;;  %v427_v1 = vpop.permute.xlu1 %426 }
 0x26f   :  { %v460_v6 = vmul.f32 %v427_v1, %v1737_v57  ;;  %v447_v18 = vmul.f32 %v401_v0, %v1599_v29  ;;  %v1831_v1 = vld [vmem:[%s2099_s4 + $0x30] sm:$0xff] }
 0x271   :  { %250 = vrot.lane.b32.xlu1 %v1751_v3, %s1495_s8  ;;  %500 = vrot.lane.b32.xlu0 %v457_v2, %s1498_s27 }
 0x272   :  { %v403_v4 = vpop.permute.xlu0 %402  ;;  %v399_v5 = vpop.permute.xlu1 %398 }
 0x273   :  { %v446_v14 = vmul.f32 %v399_v5, %v1559_v23 }
 0x275   :  { %252 = vrot.lane.b32.xlu0 %v1760_v7, %s1495_s8  ;;  %506 = vrot.lane.b32.xlu1 %v460_v6, %s1498_s27  ;;  %v1840_v6 = vld [vmem:[%s2099_s4 + $0x38] sm:$0xff]  ;;  %s1499_s4 = smov 80  }
 0x276   :  { %v405_v8 = vpop.permute.xlu0 %404  ;;  %v1765_v9 = vpop.permute.xlu1 %130 }
 0x277   :  { %v448_v43 = vmul.f32 %v403_v4, %v1765_v9 }
 0x279   :  { %508 = vrot.lane.b32.xlu0 %v461_v10, %s1498_s27  ;;  %222 = vrot.lane.b32.xlu1 %v1771_v11, %s1495_s8  ;;  %v374_v10 = vmul.f32 %v1702_v45, %v1722_v49 }
 0x27a   :  { %v409_v12 = vpop.permute.xlu0 %408  ;;  %v1776_v13 = vpop.permute.xlu1 %133 }
 0x27b   :  { %v449_v53 = vmul.f32 %v405_v8, %v1776_v13  ;;  %v451_v0 = vmul.f32 %v409_v12, %v1602_v30  ;;  %v375_v8 = vmul.f32 %v1689_v42, %v1722_v49 }
 0x27d   :  { %224 = vrot.lane.b32.xlu0 %v1782_v15, %s1495_s8  ;;  %478 = vrot.lane.b32.xlu1 %v446_v14, %s1498_s27 }
 0x27e   :  { %v411_v16 = vpop.permute.xlu0 %410  ;;  %v407_v17 = vpop.permute.xlu1 %406 }
 0x27f   :  { %v450_v60 = vmul.f32 %v1557_v22, %v407_v17 }
 0x281   :  { %480 = vrot.lane.b32.xlu0 %v447_v18, %s1498_s27  ;;  %226 = vrot.lane.b32.xlu1 %v1791_v19, %s1495_s8 }
 0x282   :  { %v413_v20 = vpop.permute.xlu0 %412  ;;  %v1796_v21 = vpop.permute.xlu1 %140 }
 0x283   :  { %v452_v4 = vmul.f32 %v411_v16, %v1796_v21 }
 0x285   :  { %228 = vrot.lane.b32.xlu0 %v1802_v48, %s1495_s8  ;;  %482 = vrot.lane.b32.xlu1 %v448_v43, %s1498_s27 }
 0x286   :  { %v241_v51 = vpop.permute.xlu0 %240  ;;  %v1807_v52 = vpop.permute.xlu1 %143 }
 0x287   :  { %v453_v18 = vmul.f32 %v413_v20, %v1807_v52  ;;  %v279_v42 = vmul.f32 %v241_v51, %v1722_v49 }
 0x289   :  { %230 = vrot.lane.b32.xlu1 %v1813_v54, %s1495_s8  ;;  %484 = vrot.lane.b32.xlu0 %v449_v53, %s1498_s27 }
 0x28a   :  { %v245_v55 = vpop.permute.xlu0 %244  ;;  %v239_v59 = vpop.permute.xlu1 %238 }
 0x28b   :  { %v278_v14 = vmul.f32 %v239_v59, %v1722_v49  ;;  %v281_v45 = vmul.f32 %v245_v55, %v1735_v56  ;;  %v379_v55 = vmul.f32 %v1716_v47, %v1739_v58 }
 0x28d   :  { %232 = vrot.lane.b32.xlu0 %v1822_v61, %s1495_s8  ;;  %486 = vrot.lane.b32.xlu1 %v450_v60, %s1498_s27  ;;  %v378_v60 = vmul.f32 %v1727_v50, %v1739_v58 }
 0x28e   :  { %v249_v62 = vpop.permute.xlu0 %248  ;;  %v243_v63 = vpop.permute.xlu1 %242 }
 0x28f   :  { %v280_v53 = vmul.f32 %v243_v63, %v1735_v56  ;;  %v283_v20 = vmul.f32 %v249_v62, %v1739_v58  ;;  %v376_v62 = vmul.f32 %v1711_v46, %v1735_v56  ;;  %v380_v46 = vmul.f32 %v1751_v3, %v1737_v57 }
 0x291   :  { %488 = vrot.lane.b32.xlu0 %v451_v0, %s1498_s27  ;;  %234 = vrot.lane.b32.xlu1 %v1831_v1, %s1495_s8 }
 0x292   :  { %v247_v2 = vpop.permute.xlu1 %246  ;;  %v497_v5 = vpop.permute.xlu0 %496 }
 0x293   :  { %v535_v16 = vadd.f32 %v497_v5, %v375_v8  ;;  %v282_v59 = vmul.f32 %v247_v2, %v1739_v58  ;;  %v377_v2 = vmul.f32 %v1697_v44, %v1735_v56  ;;  %v381_v44 = vmul.f32 %v1760_v7, %v1737_v57 }
 0x295   :  { %236 = vrot.lane.b32.xlu0 %v1840_v6, %s1495_s8  ;;  %490 = vrot.lane.b32.xlu1 %v452_v4, %s1498_s27 }
 0x296   :  { %v495_v12 = vpop.permute.xlu1 %494 }
 0x297   :  { %v534_v17 = vadd.f32 %v495_v12, %v374_v10 }
 0x299   :  { %v1406_v43 = vpack.i.bf16 %v535_v16, %v534_v17  ;;  %492 = vrot.lane.b32.xlu0 %v453_v18, %s1498_s27  ;;  %318 = vrot.lane.b32.xlu1 %v278_v14, %s1498_s27 }
 0x29d   :  { %320 = vrot.lane.b32.xlu0 %v279_v42, %s1498_s27  ;;  %1407 = vrot.lane.b32.xlu1 %v1406_v43, %s1495_s8 }
 0x2a1   :  { %322 = vrot.lane.b32.xlu0 %v280_v53, %s1498_s27  ;;  %324 = vrot.lane.b32.xlu1 %v281_v45, %s1498_s27 }
 0x2a5   :  { %328 = vrot.lane.b32.xlu0 %v283_v20, %s1498_s27  ;;  %326 = vrot.lane.b32.xlu1 %v282_v59, %s1498_s27 }
 0x2db   :  { %v503_v51 = vpop.permute.xlu1 %502 }
 0x2dc   :  { %v538_v4 = vadd.f32 %v503_v51, %v378_v60  ;;  %v366_v60 = vmul.f32 %v1771_v11, %v1559_v23  ;;  %v368_v11 = vmul.f32 %v1791_v19, %v1765_v9  ;;  %v370_v19 = vmul.f32 %v1557_v22, %v1813_v54 }
 0x2dd   :  { %v372_v54 = vmul.f32 %v1831_v1, %v1796_v21  ;;  %v198_v1 = vmul.f32 %v1574_v25, %v1722_v49  ;;  %v194_v25 = vmul.f32 %v1557_v22, %v1672_v40 }
 0x2df   :  { %v505_v63 = vpop.permute.xlu0 %504  ;;  %v499_v0 = vpop.permute.xlu1 %498 }
 0x2e0   :  { %v539_v5 = vadd.f32 %v505_v63, %v379_v55  ;;  %v536_v14 = vadd.f32 %v499_v0, %v376_v62 }
 0x2e2   :  { %v1411_v8 = vpack.i.bf16 %v539_v5, %v538_v4  ;;  %v367_v5 = vmul.f32 %v1782_v15, %v1599_v29 }
 0x2e3   :  { %v501_v10 = vpop.permute.xlu0 %500  ;;  %v251_v12 = vpop.permute.xlu1 %250 }
 0x2e4   :  { %v537_v16 = vadd.f32 %v501_v10, %v377_v2  ;;  %1412 = vrot.lane.b32.xlu1 %v1411_v8, %s1495_s8  ;;  %v284_v43 = vmul.f32 %v251_v12, %v1737_v57 }
 0x2e6   :  { %v1416_v50 = vpack.i.bf16 %v537_v16, %v536_v14 }
 0x2e7   :  { %v253_v17 = vpop.permute.xlu0 %252  ;;  %v507_v47 = vpop.permute.xlu1 %506 }
 0x2e8   :  { %v285_v18 = vmul.f32 %v253_v17, %v1737_v57  ;;  %1417 = vrot.lane.b32.xlu0 %v1416_v50, %s1495_s8  ;;  %v540_v53 = vadd.f32 %v507_v47, %v380_v46  ;;  %v369_v50 = vmul.f32 %v1802_v48, %v1776_v13 }
 0x2ea   :  { %332 = vrot.lane.b32.xlu1 %v285_v18, %s1498_s27 }
 0x2eb   :  { %v509_v42 = vpop.permute.xlu0 %508  ;;  %v223_v45 = vpop.permute.xlu1 %222 }
 0x2ec   :  { %v541_v20 = vadd.f32 %v509_v42, %v381_v44  ;;  %v270_v59 = vmul.f32 %v223_v45, %v1559_v23  ;;  %330 = vrot.lane.b32.xlu0 %v284_v43, %s1498_s27  ;;  %v371_v45 = vmul.f32 %v1822_v61, %v1602_v30 }
 0x2ee   :  { %v1421_v51 = vpack.i.bf16 %v541_v20, %v540_v53  ;;  %302 = vrot.lane.b32.xlu1 %v270_v59, %s1498_s27 }
 0x2ef   :  { %v225_v3 = vpop.permute.xlu0 %224  ;;  %v479_v55 = vpop.permute.xlu1 %478 }
 0x2f0   :  { %v526_v63 = vadd.f32 %v479_v55, %v366_v60  ;;  %1422 = vrot.lane.b32.xlu0 %v1421_v51, %s1495_s8  ;;  %v271_v7 = vmul.f32 %v225_v3, %v1599_v29 }
 0x2f2   :  { %558 = vrot.lane.b32.xlu1 %v526_v63, %s1495_s8  ;;  %v373_v63 = vmul.f32 %v1840_v6, %v1807_v52 }
 0x2f3   :  { %v481_v0 = vpop.permute.xlu0 %480  ;;  %v227_v4 = vpop.permute.xlu1 %226 }
 0x2f4   :  { %v272_v8 = vmul.f32 %v227_v4, %v1765_v9  ;;  %304 = vrot.lane.b32.xlu0 %v271_v7, %s1498_s27  ;;  %v527_v62 = vadd.f32 %v481_v0, %v367_v5  ;;  %v199_v0 = vmul.f32 %v1581_v26, %v1722_v49 }
 0x2f6   :  { %306 = vrot.lane.b32.xlu1 %v272_v8, %s1498_s27 }
 0x2f7   :  { %v229_v2 = vpop.permute.xlu0 %228  ;;  %v483_v10 = vpop.permute.xlu1 %482 }
 0x2f8   :  { %v528_v12 = vadd.f32 %v483_v10, %v368_v11  ;;  %560 = vrot.lane.b32.xlu0 %v527_v62, %s1495_s8  ;;  %v273_v14 = vmul.f32 %v229_v2, %v1776_v13 }
 0x2fa   :  { %562 = vrot.lane.b32.xlu1 %v528_v12, %s1495_s8 }
 0x2fb   :  { %v485_v15 = vpop.permute.xlu0 %484  ;;  %v231_v16 = vpop.permute.xlu1 %230 }
 0x2fc   :  { %v274_v17 = vmul.f32 %v1557_v22, %v231_v16  ;;  %308 = vrot.lane.b32.xlu0 %v273_v14, %s1498_s27  ;;  %v529_v47 = vadd.f32 %v485_v15, %v369_v50  ;;  %v200_v50 = vmul.f32 %v1588_v27, %v1735_v56 }
 0x2fe   :  { %310 = vrot.lane.b32.xlu1 %v274_v17, %s1498_s27  ;;  %v201_v17 = vmul.f32 %v1595_v28, %v1735_v56 }
 0x2ff   :  { %v233_v18 = vpop.permute.xlu0 %232  ;;  %v487_v43 = vpop.permute.xlu1 %486 }
 0x300   :  { %v530_v46 = vadd.f32 %v487_v43, %v370_v19  ;;  %564 = vrot.lane.b32.xlu0 %v529_v47, %s1495_s8  ;;  %v275_v44 = vmul.f32 %v233_v18, %v1602_v30  ;;  %v203_v47 = vmul.f32 %v1609_v31, %v1739_v58  ;;  %v202_v19 = vmul.f32 %v1566_v24, %v1739_v58 }
 0x302   :  { %566 = vrot.lane.b32.xlu1 %v530_v46, %s1495_s8 }
 0x303   :  { %v489_v48 = vpop.permute.xlu0 %488  ;;  %v235_v42 = vpop.permute.xlu1 %234 }
 0x304   :  { %v276_v53 = vmul.f32 %v235_v42, %v1796_v21  ;;  %312 = vrot.lane.b32.xlu0 %v275_v44, %s1498_s27  ;;  %v531_v20 = vadd.f32 %v489_v48, %v371_v45 }
 0x306   :  { %314 = vrot.lane.b32.xlu1 %v276_v53, %s1498_s27 }
 0x307   :  { %v237_v59 = vpop.permute.xlu0 %236  ;;  %v491_v51 = vpop.permute.xlu1 %490 }
 0x308   :  { %v532_v60 = vadd.f32 %v491_v51, %v372_v54  ;;  %568 = vrot.lane.b32.xlu0 %v531_v20, %s1495_s8  ;;  %v277_v3 = vmul.f32 %v237_v59, %v1807_v52  ;;  %v205_v51 = vmul.f32 %v1614_v32, %v1737_v57 }
 0x30a   :  { %570 = vrot.lane.b32.xlu1 %v532_v60, %s1495_s8 }
 0x30b   :  { %v493_v61 = vpop.permute.xlu0 %492  ;;  %v319_v55 = vpop.permute.xlu1 %318 }
 0x30c   :  { %316 = vrot.lane.b32.xlu0 %v277_v3, %s1498_s27  ;;  %v533_v7 = vadd.f32 %v493_v61, %v373_v63  ;;  %v358_v8 = vsub.f32 %v198_v1, %v319_v55  ;;  %v204_v3 = vmul.f32 %v1623_v33, %v1737_v57  ;;  %v190_v61 = vmul.f32 %v1642_v36, %v1559_v23 }
 0x30f   :  { %v321_v4 = vpop.permute.xlu0 %320  ;;  %v1408_v5 = vpop.permute.xlu1 %1407 }
 0x310   :  { %v359_v62 = vsub.f32 %v199_v0, %v321_v4  ;;  %v1410_v11 = vunpack.i.h.bf16 %v1408_v5  ;;  %v1409_v2 = vunpack.i.l.bf16 %v1408_v5  ;;  %572 = vrot.lane.b32.xlu0 %v533_v7, %s1495_s8 }
 0x312   :  { %v615_v6 = vsel %vm606_vm1, %v358_v8, %v1409_v2  ;;  %v616_v10 = vsel %vm606_vm1, %v359_v62, %v1410_v11 }
 0x313   :  { %v1346_v26 = vpack.c.bf16 %v616_v10, %v615_v6  ;;  %v325_v49 = vpop.permute.xlu1 %324  ;;  %v323_v12 = vpop.permute.xlu0 %322 }
 0x314   :  { %v360_v46 = vsub.f32 %v200_v50, %v323_v12  ;;  %v361_v44 = vsub.f32 %v201_v17, %v325_v49  ;;  %v191_v49 = vmul.f32 %v1628_v34, %v1599_v29  ;;  %v192_v12 = vmul.f32 %v1637_v35, %v1765_v9 }
 0x315   :  { %1348 = vmatprep.subr.msk.bf16.mxu1 %vm1931_vm3, %v1346_v26 }
 0x316   :  { %1351 = vmatpush3.bf16.xpose.msk.msra.mxu1 %vm1931_vm3, %v1346_v26 }
 0x317   :  { %v327_v14 = vpop.permute.xlu1 %326  ;;  %v329_v15 = vpop.permute.xlu0 %328 }
 0x318   :  { %v363_v42 = vsub.f32 %v203_v47, %v329_v15  ;;  %v362_v45 = vsub.f32 %v202_v19, %v327_v14  ;;  %v193_v47 = vmul.f32 %v1651_v37, %v1776_v13  ;;  %v196_v13 = vmul.f32 %v1667_v39, %v1796_v21 }
 0x356   :  { %v1413_v16 = vpop.permute.xlu1 %1412 }
 0x357   :  { %v1415_v18 = vunpack.i.h.bf16 %v1413_v16  ;;  %v1414_v43 = vunpack.i.l.bf16 %v1413_v16 }
 0x359   :  { %v620_v27 = vsel %vm606_vm1, %v363_v42, %v1415_v18  ;;  %v619_v28 = vsel %vm606_vm1, %v362_v45, %v1414_v43 }
 0x35a   :  { %v1418_v48 = vpop.permute.xlu0 %1417  ;;  %v1358_v58 = vpack.c.bf16 %v620_v27, %v619_v28 }
 0x35b   :  { %v1420_v53 = vunpack.i.h.bf16 %v1418_v48  ;;  %v1419_v20 = vunpack.i.l.bf16 %v1418_v48 }
 0x35c   :  { %v333_v54 = vpop.permute.xlu1 %332 }
 0x35d   :  { %v617_v56 = vsel %vm606_vm1, %v360_v46, %v1419_v20  ;;  %v618_v31 = vsel %vm606_vm1, %v361_v44, %v1420_v53  ;;  %v365_v55 = vsub.f32 %v205_v51, %v333_v54  ;;  %v195_v46 = vmul.f32 %v1659_v38, %v1602_v30 }
 0x35e   :  { %v1352_v59 = vpack.c.bf16 %v618_v31, %v617_v56  ;;  %v331_v24 = vpop.permute.xlu0 %330  ;;  %v197_v53 = vmul.f32 %v1681_v41, %v1807_v52 }
 0x35f   :  { %v364_v7 = vsub.f32 %v204_v3, %v331_v24 }
 0x360   :  { %v303_v60 = vpop.permute.xlu1 %302  ;;  %1354 = vmatprep.subr.msk.bf16.mxu1 %vm1931_vm3, %v1352_v59 }
 0x361   :  { %1357 = vmatpush3.bf16.xpose.msk.msra.mxu1 %vm1931_vm3, %v1352_v59  ;;  %v350_v32 = vsub.f32 %v190_v61, %v303_v60 }
 0x362   :  { %v1423_v63 = vpop.permute.xlu0 %1422  ;;  %1360 = vmatprep.subr.msk.bf16.mxu1 %vm1931_vm3, %v1358_v58 }
 0x363   :  { %v1425_v1 = vunpack.i.h.bf16 %v1423_v63  ;;  %v1424_v0 = vunpack.i.l.bf16 %v1423_v63 }
 0x364   :  { %v559_v4 = vpop.permute.xlu1 %558 }
 0x365   :  { %v621_v5 = vsel %vm606_vm1, %v364_v7, %v1424_v0  ;;  %v622_v33 = vsel %vm606_vm1, %v365_v55, %v1425_v1  ;;  %v607_v57 = vsel %vm606_vm1, %v350_v32, %v559_v4 }
 0x366   :  { %v305_v36 = vpop.permute.xlu0 %304  ;;  %1287 = vmatprep.mubr.msk.f32.mxu1 %vm623_vm2, %v607_v57  ;;  %v1364_v8 = vpack.c.bf16 %v622_v33, %v621_v5 }
 0x367   :  { %v351_v15 = vsub.f32 %v191_v49, %v305_v36  ;;  %v1426_v36 = vpack.i.bf16 %v1599_v29, %v1559_v23 }
 0x368   :  { %v307_v62 = vpop.permute.xlu1 %306 }
 0x369   :  { %1363 = vmatpush3.bf16.xpose.msk.msra.mxu1 %vm1931_vm3, %v1358_v58  ;;  %v352_v16 = vsub.f32 %v192_v12, %v307_v62 }
 0x36a   :  { %v561_v11 = vpop.permute.xlu0 %560  ;;  %1366 = vmatprep.subr.msk.bf16.mxu1 %vm1931_vm3, %v1364_v8 }
 0x36b   :  { %v608_v17 = vsel %vm606_vm1, %v351_v15, %v561_v11 }
 0x36c   :  { %v563_v2 = vpop.permute.xlu1 %562 }
 0x36d   :  { %v609_v19 = vsel %vm606_vm1, %v352_v16, %v563_v2 }
 0x36e   :  { %v309_v6 = vpop.permute.xlu0 %308 }
 0x36f   :  { %v353_v34 = vsub.f32 %v193_v47, %v309_v6 }
 0x370   :  { %v311_v10 = vpop.permute.xlu1 %310 }
 0x371   :  { %1369 = vmatpush3.bf16.xpose.msk.msra.mxu1 %vm1931_vm3, %v1364_v8  ;;  %v354_v35 = vsub.f32 %v194_v25, %v311_v10  ;;  %v785_v8 = vlaneseq }
 0x372   :  { %v565_v26 = vpop.permute.xlu0 %564 }
 0x373   :  { %v610_v43 = vsel %vm606_vm1, %v353_v34, %v565_v26  ;;  %v786_v6 = vshrl.u32 %v785_v8, 7  ;;  %v803_v16 = vand.u32 127, %v785_v8 }
 0x374   :  { %v567_v14 = vpop.permute.xlu1 %566 }
 0x375   :  { %v611_v37 = vsel %vm606_vm1, %v354_v35, %v567_v14  ;;  %v787_v15 = vadd.s32 8, %v786_v6  ;;  %v789_v47 = vadd.s32 24, %v786_v6  ;;  %v2012_v34 = vshra.s32 %v803_v16, 3 }
 0x376   :  { %v313_v50 = vpop.permute.xlu0 %312 }
 0x377   :  { %v355_v40 = vsub.f32 %v195_v46, %v313_v50  ;;  %v788_v46 = vadd.s32 16, %v786_v6 }
 0x378   :  { %v315_v18 = vpop.permute.xlu1 %314  ;;  %1288 = vmatmul.mubr.msk.f32.vlgmr.msra.gmra.mrb[0].mxu1 %vm623_vm2, %v608_v17 }
 0x379   :  { %1290 = vmatprep.mubr.msk.f32.mxu1 %vm623_vm2, %v609_v19  ;;  %v356_v48 = vsub.f32 %v196_v13, %v315_v18  ;;  %v795_v18 = vshra.s32 %v787_v15, 3 }
 0x37a   :  { %v569_v9 = vpop.permute.xlu0 %568 }
 0x37b   :  { %v612_v45 = vsel %vm606_vm1, %v355_v40, %v569_v9  ;;  %v797_v40 = vshra.s32 %v789_v47, 3  ;;  %vm806_vm5 = vcmp.eq.s32.totalorder %v795_v18, %v2012_v34 }
 0x37c   :  { %1291 = vmatmul.mubr.msk.f32.gmra.mrb[2].mxu1 %vm623_vm2, %v610_v43  ;;  %v571_v44 = vpop.permute.xlu1 %570  ;;  %v794_v43 = vshra.s32 %v786_v6, 3 }
 0x37d   :  { %1293 = vmatprep.mubr.msk.f32.mxu1 %vm623_vm2, %v611_v37  ;;  %v613_v38 = vsel %vm606_vm1, %v356_v48, %v571_v44  ;;  %vm2019_vm7 = vcmp.eq.s32.totalorder %v797_v40, %v2012_v34 }
 0x37e   :  { %v317_v42 = vpop.permute.xlu0 %316  ;;  %vm805_vm6 = vcmp.eq.s32.totalorder %v794_v43, %v2012_v34 }
 0x37f   :  { %v357_v20 = vsub.f32 %v197_v53, %v317_v42  ;;  %v791_v42 = vadd.s32 40, %v786_v6 }
 0x380   :  { %1294 = vmatmul.mubr.msk.f32.gmra.mrb[4].mxu1 %vm623_vm2, %v612_v45 }
 0x381   :  { %1296 = vmatprep.mubr.msk.f32.mxu1 %vm623_vm2, %v613_v38 }
 0x382   :  { %v573_v39 = vpop.permute.xlu0 %572 }
 0x383   :  { %v614_v21 = vsel %vm606_vm1, %v357_v20, %v573_v39  ;;  %v796_v20 = vshra.s32 %v788_v46, 3  ;;  %v790_v39 = vadd.s32 32, %v786_v6 }
 0x384   :  { %1297 = vmatmul.mubr.msk.f32.gmra.mrb[6].mxu1 %vm623_vm2, %v614_v21 }
 0x385   :  { %vm807_vm8 = vcmp.eq.s32.totalorder %v796_v20, %v2012_v34 }
 0x44b   :  { %v1289_v54 = vpop.f32.mrb[0].mxu1 }
 0x44c   :  { %v778_v27 = vmul.f32 0.35355338, %v1289_v54  ;;  %v738_v28 = vpop.f32.mrb[1].mxu1 }
 0x44d   :  { %v777_v56 = vmul.f32 0.35355338, %v738_v28 }
 0x44e   :  { %v817_v31 = vsel %vm813_vm4, %v778_v27, -inf }
 0x44f   :  { %818 = vmax.xlane.f32.xlu0 %v817_v31  ;;  %v1292_v41 = vpop.f32.mrb[2].mxu1  ;;  %v814_v52 = vsel %vm813_vm4, %v777_v56, -inf }
 0x450   :  { %v780_v59 = vmul.f32 0.35355338, %v1292_v41  ;;  %815 = vmax.xlane.f32.xlu1 %v814_v52  ;;  %v748_v24 = vpop.f32.mrb[3].mxu1 }
 0x451   :  { %v779_v58 = vmul.f32 0.35355338, %v748_v24  ;;  %v793_v24 = vadd.s32 56, %v786_v6 }
 0x452   :  { %v823_v51 = vsel %vm813_vm4, %v780_v59, -inf }
 0x453   :  { %v1295_v60 = vpop.f32.mrb[4].mxu1  ;;  %v820_v3 = vsel %vm813_vm4, %v779_v58, -inf }
 0x454   :  { %v782_v61 = vmul.f32 0.35355338, %v1295_v60  ;;  %824 = vmax.xlane.f32.xlu1 %v823_v51  ;;  %821 = vmax.xlane.f32.xlu0 %v820_v3  ;;  %v758_v55 = vpop.f32.mrb[5].mxu1  ;;  %v798_v3 = vshra.s32 %v790_v39, 3 }
 0x455   :  { %v781_v63 = vmul.f32 0.35355338, %v758_v55 }
 0x456   :  { %v829_v7 = vsel %vm813_vm4, %v782_v61, -inf  ;;  %vm809_vm10 = vcmp.eq.s32.totalorder %v798_v3, %v2012_v34 }
 0x457   :  { %v1298_v32 = vpop.f32.mrb[6].mxu1  ;;  %v826_v1 = vsel %vm813_vm4, %v781_v63, -inf }
 0x458   :  { %v784_v0 = vmul.f32 0.35355338, %v1298_v32  ;;  %830 = vmax.xlane.f32.xlu1 %v829_v7  ;;  %827 = vmax.xlane.f32.xlu0 %v826_v1  ;;  %v768_v4 = vpop.f32.mrb[7].mxu1 }
 0x459   :  { %v783_v5 = vmul.f32 0.35355338, %v768_v4 }
 0x45a   :  { %v835_v33 = vsel %vm813_vm4, %v784_v0, -inf }
 0x45b   :  { %v832_v57 = vsel %vm813_vm4, %v783_v5, -inf }
 0x45c   :  { %836 = vmax.xlane.f32.xlu1 %v835_v33  ;;  %833 = vmax.xlane.f32.xlu0 %v832_v57 }
 0x472   :  { %1427 = vrot.lane.b32.xlu0 %v1426_v36, %s1499_s4 }
 0x4dc   :  { %v819_v62 = vpop.xlane.xlu0 %818 }
 0x4dd   :  { %v839_v11 = vsub.f32 %v778_v27, %v819_v62  ;;  %v816_v2 = vpop.xlane.xlu1 %815 }
 0x4de   :  { %v838_v10 = vsub.f32 %v777_v56, %v816_v2  ;;  %v1085_v56 = vld [vmem:[%s2097_s2 + $0x10] sm:$0xff] }
 0x4df   :  { %v848_v26 = vmul.f32 1.442695, %v839_v11 }
 0x4e0   :  { %v846_v49 = vmul.f32 1.442695, %v838_v10 }
 0x4e1   :  { %1435 = vpow2.f32 %v848_v26  ;;  %v825_v12 = vpop.xlane.xlu1 %824  ;;  %v822_v14 = vpop.xlane.xlu0 %821 }
 0x4e2   :  { %1437 = vpow2.f32 %v846_v49  ;;  %v841_v50 = vsub.f32 %v780_v59, %v825_v12  ;;  %v840_v17 = vsub.f32 %v779_v58, %v822_v14  ;;  %v799_v59 = vshra.s32 %v791_v42, 3 }
 0x4e4   :  { %v852_v23 = vmul.f32 1.442695, %v841_v50  ;;  %v850_v29 = vmul.f32 1.442695, %v840_v17  ;;  %vm810_vm9 = vcmp.eq.s32.totalorder %v799_v59, %v2012_v34 }
 0x4e5   :  { %v831_v19 = vpop.xlane.xlu1 %830  ;;  %v828_v25 = vpop.xlane.xlu0 %827 }
 0x4e6   :  { %1439 = vpow2.f32 %v852_v23  ;;  %v843_v35 = vsub.f32 %v782_v61, %v831_v19  ;;  %v842_v9 = vsub.f32 %v781_v63, %v828_v25  ;;  %v792_v63 = vadd.s32 48, %v786_v6 }
 0x4e7   :  { %1441 = vpow2.f32 %v850_v29 }
 0x4e8   :  { %v856_v37 = vmul.f32 1.442695, %v843_v35  ;;  %v854_v13 = vmul.f32 1.442695, %v842_v9  ;;  %v800_v36 = vshra.s32 %v792_v63, 3 }
 0x4e9   :  { %v837_v44 = vpop.xlane.xlu1 %836  ;;  %v834_v48 = vpop.xlane.xlu0 %833 }
 0x4ea   :  { %1443 = vpow2.f32 %v856_v37  ;;  %v845_v45 = vsub.f32 %v784_v0, %v837_v44  ;;  %v844_v53 = vsub.f32 %v783_v5, %v834_v48  ;;  %v801_v5 = vshra.s32 %v793_v24, 3 }
 0x4eb   :  { %v1436_v38 = vpop.eup %1435  ;;  %1445 = vpow2.f32 %v854_v13  ;;  %vm811_vm12 = vcmp.eq.s32.totalorder %v800_v36, %v2012_v34 }
 0x4ec   :  { %v1438_v21 = vpop.eup %1437  ;;  %v860_v54 = vmul.f32 1.442695, %v845_v45  ;;  %v858_v27 = vmul.f32 1.442695, %v844_v53  ;;  %v2016_v28 = vsel %vm806_vm5, %v1436_v38, 0.0  ;;  %vm812_vm11 = vcmp.eq.s32.totalorder %v801_v5, %v2012_v34 }
 0x4ed   :  { %v1428_v31 = vpop.permute.xlu0 %1427  ;;  %v873_v41 = vsel %vm813_vm4, %v2016_v28, 0.0  ;;  %v862_v52 = vsel %vm805_vm6, %v1438_v21, 0.0 }
 0x4ee   :  { %1447 = vpow2.f32 %v860_v54  ;;  %v1430_v58 = vunpack.i.h.bf16 %v1428_v31  ;;  %v1429_v51 = vunpack.i.l.bf16 %v1428_v31  ;;  %874 = vadd.xlane.f32.xlu1 %v873_v41  ;;  %v870_v60 = vsel %vm813_vm4, %v862_v52, 0.0  ;;  %v1083_v54 = vld [vmem:[%s2097_s2] sm:$0xff]  ;;  %v1086_v31 = vld [vmem:[%s2097_s2 + $0x18] sm:$0xff] }
 0x4ef   :  { %1449 = vpow2.f32 %v858_v27  ;;  %871 = vadd.xlane.f32.xlu0 %v870_v60  ;;  %v1084_v27 = vld [vmem:[%s2097_s2 + $0x8] sm:$0xff]  ;;  %v1390_v41 = vpack.c.bf16 %v1086_v31, %v1085_v56  ;;  %s1503_s2 = smov [#allocation2]  }
 0x4f0   :  { %v1440_v61 = vpop.eup %1439  ;;  %v1370_v55 = vpack.c.bf16 %v1429_v51, %v1429_v51  ;;  %v1374_v1 = vpack.c.bf16 %v1430_v58, %v1430_v58  ;;  %s1177_s6 = sshll.u32 %s1503_s2, 4  ;;  %s1178_s6 = int_to_ptr.vmem [resolvable:$true] %s1177_s6 }
 0x4f1   :  { %v1442_v7 = vpop.eup %1441  ;;  %v2029_v32 = vsel %vm2019_vm7, %v1440_v61, 0.0  ;;  %s1469_s12 = scalar_lea.vmem %s1178_s6, 256  ;;  %p1474_p1 = scmp.lt.s32.totalorder %s1178_s6, %s1178_s6 }
 0x4f2   :  { %1371 = vmatprep.subr.bf16.mxu0 %v1370_v55  ;;  %v879_v0 = vsel %vm813_vm4, %v2029_v32, 0.0  ;;  %v864_v4 = vsel %vm807_vm8, %v1442_v7, 0.0  ;;  %p1470_p0 = scmp.ne.s32.totalorder %s1178_s6, %s1469_s12  ;;  %p1475_p2 = scmp.lt.s32.totalorder %s1469_s12, %s1469_s12 }
 0x4f3   :  { %880 = vadd.xlane.f32.xlu1 %v879_v0  ;;  %v876_v33 = vsel %vm813_vm4, %v864_v4, 0.0  ;;  %1373 = vmatpush3.bf16.msra.mxu0 %v1370_v55 }
 0x4f4   :  { %v1444_v57 = vpop.eup %1443  ;;  %877 = vadd.xlane.f32.xlu0 %v876_v33  ;;  %1375 = vmatprep.subr.bf16.mxu0 %v1374_v1  ;;  %p1476_p3 = por %p1475_p2, %p1474_p1 }
 0x4f5   :  { %v1446_v8 = vpop.eup %1445  ;;  %v867_v62 = vsel %vm810_vm9, %v1444_v57, 0.0 }
 0x4f6   :  { %v885_v11 = vsel %vm813_vm4, %v867_v62, 0.0  ;;  %v866_v2 = vsel %vm809_vm10, %v1446_v8, 0.0  ;;  %p1477_p4 = pnand %p1476_p3, %p1470_p0 }
 0x4f7   :  { %886 = vadd.xlane.f32.xlu1 %v885_v11  ;;  %v882_v6 = vsel %vm813_vm4, %v866_v2, 0.0  ;;  %1377 = vmatpush3.bf16.msra.mxu0 %v1374_v1  ;;  %v1467_v11 = vld [vmem:[%s2095_s0 + $0x8] sm:$0xff] }
 0x4f8   :  { %v1448_v10 = vpop.eup %1447  ;;  %883 = vadd.xlane.f32.xlu0 %v882_v6 }
 0x4f9   :  { %v1450_v26 = vpop.eup %1449  ;;  %v869_v49 = vsel %vm812_vm11, %v1448_v10, 0.0  ;;  %v1468_v10 = vld [vmem:[%s2095_s0] sm:$0xff] }
 0x4fa   :  { %v891_v12 = vsel %vm813_vm4, %v869_v49, 0.0  ;;  %v868_v14 = vsel %vm811_vm12, %v1450_v26, 0.0 }
 0x4fb   :  { %892 = vadd.xlane.f32.xlu1 %v891_v12  ;;  %v888_v15 = vsel %vm813_vm4, %v868_v14, 0.0 }
 0x4ff   :  { %889 = vadd.xlane.f32.xlu1 %v888_v15 }
 0x50e   :  { %916 = vrot.lane.b32.xlu0 %v1602_v30, %s1499_s4 }
 0x510   :  { %914 = vrot.lane.b32.xlu1 %v1557_v22, %s1499_s4 }
 0x57b   :  { %v875_v16 = vpop.xlane.xlu1 %874 }
 0x57c   :  { %v872_v50 = vpop.xlane.xlu0 %871 }
 0x57d   :  { %1451 = vrcp.f32 %v872_v50 }
 0x57e   :  { %1453 = vrcp.f32 %v875_v16 }
 0x580   :  { %v881_v17 = vpop.xlane.xlu1 %880 }
 0x581   :  { %v878_v23 = vpop.xlane.xlu0 %877 }
 0x582   :  { %1455 = vrcp.f32 %v878_v23 }
 0x583   :  { %1457 = vrcp.f32 %v881_v17 }
 0x584   :  { %v887_v29 = vpop.xlane.xlu1 %886 }
 0x585   :  { %v884_v18 = vpop.xlane.xlu0 %883 }
 0x586   :  { %1459 = vrcp.f32 %v884_v18 }
 0x587   :  { %v1452_v47 = vpop.eup %1451  ;;  %1461 = vrcp.f32 %v887_v29 }
 0x588   :  { %v893_v19 = vpop.xlane.xlu1 %892  ;;  %v902_v25 = vmul.f32 %v1452_v47, %v862_v52  ;;  %v1454_v43 = vpop.eup %1453 }
 0x589   :  { %v917_v30 = vpop.permute.xlu0 %916  ;;  %v903_v37 = vmul.f32 %v1454_v43, %v2016_v28  ;;  %v1386_v28 = vpack.c.bf16 %v1084_v27, %v1083_v54 }
 0x58a   :  { %1315 = vmatprep.mubr.msk.f32.mxu0 %vm813_vm4, %v902_v25  ;;  %v1382_v9 = vpack.c.bf16 %v917_v30, %v917_v30 }
 0x58c   :  { %v890_v34 = vpop.xlane.xlu1 %889  ;;  %v1456_v46 = vpop.eup %1455 }
 0x58d   :  { %1463 = vrcp.f32 %v890_v34  ;;  %v1458_v13 = vpop.eup %1457  ;;  %v904_v40 = vmul.f32 %v1456_v46, %v864_v4 }
 0x58e   :  { %1465 = vrcp.f32 %v893_v19  ;;  %v905_v48 = vmul.f32 %v1458_v13, %v2029_v32 }
 0x590   :  { %v915_v35 = vpop.permute.xlu1 %914  ;;  %v1460_v44 = vpop.eup %1459 }
 0x591   :  { %v1378_v22 = vpack.c.bf16 %v915_v35, %v915_v35  ;;  %v1462_v42 = vpop.eup %1461  ;;  %v906_v45 = vmul.f32 %v1460_v44, %v866_v2 }
 0x592   :  { %v907_v38 = vmul.f32 %v1462_v42, %v867_v62 }
 0x593   :  { %1379 = vmatprep.subr.bf16.mxu0 %v1378_v22 }
 0x594   :  { %1381 = vmatpush3.bf16.msra.mxu0 %v1378_v22 }
 0x595   :  { %1383 = vmatprep.subr.bf16.mxu0 %v1382_v9 }
 0x597   :  { %v1464_v53 = vpop.eup %1463 }
 0x598   :  { %1385 = vmatpush3.bf16.msra.mxu0 %v1382_v9  ;;  %v1466_v20 = vpop.eup %1465  ;;  %v908_v39 = vmul.f32 %v1464_v53, %v868_v14 }
 0x599   :  { %v909_v21 = vmul.f32 %v1466_v20, %v869_v49  ;;  %1387 = vmatprep.subr.bf16.mxu0 %v1386_v28 }
 0x59b   :  { %1316 = vmatmul.mubr.msk.f32.vlgmr.msra.gmra.mrb[2].mxu0 %vm813_vm4, %v903_v37 }
 0x59c   :  { %1318 = vmatprep.mubr.msk.f32.mxu0 %vm813_vm4, %v904_v40  ;;  %1389 = vmatpush3.bf16.msra.mxu0 %v1386_v28 }
 0x59d   :  { %1391 = vmatprep.subr.bf16.mxu0 %v1390_v41 }
 0x59f   :  { %1319 = vmatmul.mubr.msk.f32.gmra.mrb[4].mxu0 %vm813_vm4, %v905_v48 }
 0x5a0   :  { %1321 = vmatprep.mubr.msk.f32.mxu0 %vm813_vm4, %v906_v45  ;;  %1393 = vmatpush3.bf16.msra.mxu0 %v1390_v41 }
 0x5a3   :  { %1322 = vmatmul.mubr.msk.f32.gmra.mrb[6].mxu0 %vm813_vm4, %v907_v38 }
 0x5a4   :  { %1324 = vmatprep.mubr.msk.f32.mxu0 %vm813_vm4, %v908_v39 }
 0x5a7   :  { %1325 = vmatmul.mubr.msk.f32.gmra.mrb[8].mxu0 %vm813_vm4, %v909_v21 }
 0x66e   :  { %v1317_v52 = vpop.f32.mrb[2].mxu0 }
 0x66f   :  { %1052 = vrot.lane.b32.xlu0 %v1317_v52, %s1500_s29  ;;  %v1012_v59 = vpop.f32.mrb[3].mxu0 }
 0x672   :  { %v1320_v24 = vpop.f32.mrb[4].mxu0 }
 0x673   :  { %1060 = vrot.lane.b32.xlu1 %v1320_v24, %s1501_s1  ;;  %v1022_v58 = vpop.f32.mrb[5].mxu0 }
 0x676   :  { %v1323_v51 = vpop.f32.mrb[6].mxu0 }
 0x677   :  { %1056 = vrot.lane.b32.xlu1 %v1022_v58, %s1502_s30  ;;  %1069 = vrot.lane.b32.xlu0 %v1323_v51, %s1500_s29  ;;  %v1032_v60 = vpop.f32.mrb[7].mxu0 }
 0x67a   :  { %v1326_v3 = vpop.f32.mrb[8].mxu0 }
 0x67b   :  { %1077 = vrot.lane.b32.xlu1 %v1326_v3, %s1501_s1  ;;  %v1042_v61 = vpop.f32.mrb[9].mxu0 }
 0x67c   :  { %1073 = vrot.lane.b32.xlu0 %v1042_v61, %s1502_s30 }
 0x6e1   :  { %v1053_v55 = vpop.permute.xlu0 %1052 }
 0x6e2   :  { %v1063_v7 = vsel %vm623_vm2, %v1012_v59, %v1053_v55 }
 0x6e5   :  { %v1061_v63 = vpop.permute.xlu1 %1060 }
 0x6e9   :  { %v1057_v32 = vpop.permute.xlu1 %1056  ;;  %v1070_v1 = vpop.permute.xlu0 %1069 }
 0x6ea   :  { %v1065_v0 = vsel %vm1064_vm13, %v1063_v7, %v1057_v32  ;;  %v1080_v5 = vsel %vm623_vm2, %v1032_v60, %v1070_v1 }
 0x6eb   :  { %v1067_v4 = vsel %vm1066_vm14, %v1065_v0, %v1061_v63 }
 0x6ec   :  { %1335 = vmatprep.mubr.msk.f32.mxu0 %vm25_vm0, %v1067_v4 }
 0x6ed   :  { %v1078_v57 = vpop.permute.xlu1 %1077 }
 0x6ee   :  { %v1074_v33 = vpop.permute.xlu0 %1073 }
 0x6ef   :  { %v1081_v36 = vsel %vm1064_vm13, %v1080_v5, %v1074_v33 }
 0x6f0   :  { %v1082_v8 = vsel %vm1066_vm14, %v1081_v36, %v1078_v57 }
 0x6f1   :  { %1336 = vmatmul.mubr.msk.f32.vlgmr.msra.gmra.mrb[10].mxu0 %vm25_vm0, %v1082_v8 }
 0x7c4   :  { %v1337_v62 = vpop.f32.mrb[10].mxu0 }
 0x7c5   :  { %v1169_v2 = vadd.f32 %v1467_v11, %v1337_v62  ;;  %v1159_v6 = vpop.f32.mrb[11].mxu0 }
 0x7c6   :  { %v1168_v26 = vadd.f32 %v1468_v10, %v1159_v6 }
 0x7c7   :  { %1171 = vst.msk [vmem:[#allocation2 + $0x8] sm:$0xff] %vm25_vm0, %v1169_v2 }
 0x7c8   :  { %1170 = vst.msk [vmem:[#allocation2] sm:$0xff] %vm25_vm0, %v1168_v26 }
 0x7c9   :  { %1480 = shalt.err (!%p1477_p4)
}
 0x7ca   :  { %s1481_s15 = scalar_lea.hbm %s2100_s5, 256 }
 0x7cb   :  { %p1482_p5 = scmp.ne.s32.totalorder %s2100_s5, %s1481_s15  ;;  %p1485_p6 = scmp.lt.u32.totalorder %s1481_s15, %s2100_s5 }
 0x7cd   :  { %p1487_p7 = pnand %p1485_p6, %p1482_p5 }
 0x7cf   :  { %1490 = shalt.err (!%p1487_p7)
}
 0x7d0   :  { %s1504_s19 = smov 128  }
 0x7d1   :  { %1183 = dma.vmem_to_hbm [thread:$0]  %s1178_s6, 256, %s2100_s5, [#allocation3], %s1504_s19, %s1504_s19, %s1500_s29  }
 0x7d2   :  { %1491 = dma.done.wait [#allocation3], 256  }
 0x7d3   :  { %1492 = vsyncadd [#allocation3], 4294967040 }
 0x7d4   :  { %1187 = vsyncpa [#allocation3], 1 }

</bundles_post_ra>
